<compile_context>
chip_gen: v6e
topology: v6e:2x2x1
jax: 0.10.0
libtpu: 0.0.40
codegen_flags: <defaults>
</compile_context>

<pallas_src>
import functools
import math

import jax
import jax.numpy as jnp
from jax import lax
from jax.experimental import pallas as pl
from jax.experimental.pallas import tpu as pltpu

LANES = 128
SUBLANES = 8
_SPLIT_MIN_TILES = 8                      # enable the 2-TC split only for >= 8 column tiles
_VMEM_LIMIT_BYTES = 48 * 1024 * 1024      # explicit scoped-VMEM limit (safe on v5e/v6e/v7x)
_F32_TEMP_BYTES = 6 * 1024 * 1024         # cap block element count via f32 temporary size


def _round_down(a, b):
    return (a // b) * b


def _round_up(a, b):
    return ((a + b - 1) // b) * b


def _default_block_bytes(itemsize):
    """Target HBM->VMEM block bytes per grid step, per chip generation."""
    try:
        vmem = pltpu.get_tpu_info().vmem_capacity_bytes
    except Exception:  # pragma: no cover - conservative fallback off-TPU / old API
        vmem = 128 * 1024 * 1024
    # v7x-class parts report ~64 MiB per TensorCore but have ~2.3x the HBM BW:
    # use bigger blocks there to amortize per-step (~0.35us) overhead.
    byte_target = 6 * 1024 * 1024 if vmem <= 96 * 1024 * 1024 else 4 * 1024 * 1024
    # Keep the in-kernel f32 cast/square temporaries bounded (matters for bf16).
    return min(byte_target, (_F32_TEMP_BYTES // 4) * itemsize)


def _choose_tiling(batch, feat, itemsize, target_bytes):
    """Pick (batch_tile, tile_cols) so padded block bytes ~= target_bytes."""
    if feat < LANES:
        col_unit = feat                              # whole (short) feature dim
        f_cols_cap = feat
    else:
        col_unit = min(4 * LANES, _round_down(feat, LANES))
        f_cols_cap = _round_down(feat, LANES)        # never exceed the array dim

    b_pad_full = _round_up(batch, SUBLANES)
    # Tile the batch only when the full batch at a minimally useful column width
    # would not fit the block budget (large B robustness; keeps blocks 2-8 MiB).
    if batch <= SUBLANES or b_pad_full * col_unit * itemsize <= target_bytes:
        batch_tile = batch
    else:
        batch_tile = _round_down(target_bytes // (itemsize * col_unit), SUBLANES)
        batch_tile = max(SUBLANES, min(batch_tile, _round_down(batch, SUBLANES)))
    batch_tiled = batch_tile != batch
    bt_pad = _round_up(batch_tile, SUBLANES)         # VMEM footprint uses padded rows

    if feat < LANES:
        tile_cols = feat
    else:
        tile_cols = _round_down(max(target_bytes // (itemsize * bt_pad), LANES), LANES)
        tile_cols = min(tile_cols, f_cols_cap)

    n_col_tiles = pl.cdiv(feat, tile_cols)
    n_batch_tiles = pl.cdiv(batch, batch_tile)
    return batch_tile, tile_cols, n_col_tiles, n_batch_tiles, batch_tiled


def _edge_cond(col_tile, k, *, n_col_tiles, n_bt, col_partial, row_partial):
    cond = None
    if col_partial:
        cond = col_tile == n_col_tiles - 1
    if row_partial:
        c = k == n_bt - 1
        cond = c if cond is None else jnp.logical_or(cond, c)
    return cond


def _mask_block(xv, col_tile, k, *, batch, feat, tile_cols, batch_tile,
                col_partial, row_partial):
    """Zero out-of-range (padded) rows/columns; zeros contribute 0 to every sum."""
    zero = jnp.zeros([], xv.dtype)
    if col_partial:
        cidx = lax.broadcasted_iota(jnp.int32, xv.shape, 1) + col_tile * tile_cols
        xv = jnp.where(cidx < feat, xv, zero)
    if row_partial:
        ridx = lax.broadcasted_iota(jnp.int32, xv.shape, 0) + k * batch_tile
        xv = jnp.where(ridx < batch, xv, zero)
    return xv


def _hloss_kernel(x_ref, sq_ref, cs2_ref, cs_ref, *, batch, feat, batch_tile,
                  tile_cols, n_col_tiles, n_bt, inner, batch_tiled,
                  col_partial, row_partial, has_overflow):
    """default branch: accumulate sum(x^2) and sum_f (sum_b x[b,f])^2."""
    o = pl.program_id(0)
    j = pl.program_id(1)
    k = pl.program_id(2)
    col_tile = o * inner + j

    @pl.when(jnp.logical_and(j == 0, k == 0))
    def _():
        sq_ref[...] = jnp.zeros_like(sq_ref)
        cs2_ref[...] = jnp.zeros_like(cs2_ref)

    def accum(xv):
        xv = xv.astype(jnp.float32)
        # Batch-axis reductions in the block's natural layout: pure row-tile VPU
        # adds + one XLU sublane reduce per lane tile (no relayouts).
        sq_cols = jnp.sum(xv * xv, axis=0, keepdims=True)       # (1, tile_cols)
        cs_cols = jnp.sum(xv, axis=0, keepdims=True)            # per-feature batch sums
        # The remaining cross-lane reduce touches only tile_cols elements
        # (1/batch_tile of the block) - negligible at the HBM roofline.  The
        # scalar is broadcast-added into the resident (1,8,128) accumulator.
        sq_ref[...] += jnp.sum(sq_cols)
        if batch_tiled:
            # Accumulate the column sums UNSQUARED across batch steps; square on
            # the last batch step only (correctness requirement for batch tiling).
            @pl.when(k == 0)
            def _():
                cs_ref[...] = cs_cols

            @pl.when(k != 0)
            def _():
                cs_ref[...] += cs_cols

            @pl.when(k == n_bt - 1)
            def _():
                c = cs_ref[...]
                cs2_ref[...] += jnp.sum(c * c)
        else:
            cs2_ref[...] += jnp.sum(cs_cols * cs_cols)

    def visit():
        xv = x_ref[...]
        if col_partial or row_partial:
            edge = _edge_cond(col_tile, k, n_col_tiles=n_col_tiles, n_bt=n_bt,
                              col_partial=col_partial, row_partial=row_partial)

            @pl.when(edge)            # masked path: only the edge tiles pay for it
            def _():
                accum(_mask_block(xv, col_tile, k, batch=batch, feat=feat,
                                  tile_cols=tile_cols, batch_tile=batch_tile,
                                  col_partial=col_partial, row_partial=row_partial))

            @pl.when(jnp.logical_not(edge))
            def _():
                accum(xv)
        else:
            accum(xv)

    if has_overflow:
        # Tiles past n_col_tiles (odd tile count split across 2 cores) are skipped
        # entirely; their DMA is clamped to a valid tile by the index_map.
        @pl.when(col_tile < n_col_tiles)
        def _():
            visit()
    else:
        visit()


def _hmask_kernel(x_ref, e_ref, *, batch, feat, batch_tile, tile_cols,
                  n_col_tiles, n_bt, inner, batch_tiled,
                  col_partial, row_partial, has_overflow):
    """is_mask branch: accumulate sum(((1 - x) * x)^2)."""
    o = pl.program_id(0)
    j = pl.program_id(1)
    k = pl.program_id(2)
    col_tile = o * inner + j
    del batch_tiled  # unused in this branch

    @pl.when(jnp.logical_and(j == 0, k == 0))
    def _():
        e_ref[...] = jnp.zeros_like(e_ref)

    def accum(xv):
        xv = xv.astype(jnp.float32)
        e = (1.0 - xv) * xv
        e_ref[...] += jnp.sum(e * e)

    def visit():
        xv = x_ref[...]
        if col_partial or row_partial:
            edge = _edge_cond(col_tile, k, n_col_tiles=n_col_tiles, n_bt=n_bt,
                              col_partial=col_partial, row_partial=row_partial)

            @pl.when(edge)
            def _():
                accum(_mask_block(xv, col_tile, k, batch=batch, feat=feat,
                                  tile_cols=tile_cols, batch_tile=batch_tile,
                                  col_partial=col_partial, row_partial=row_partial))

            @pl.when(jnp.logical_not(edge))
            def _():
                accum(xv)
        else:
            accum(xv)

    if has_overflow:
        @pl.when(col_tile < n_col_tiles)
        def _():
            visit()
    else:
        visit()


def _hloss_partials(x2d, is_mask, target_bytes):
    """Single streaming pass over the (B, F) buffer; returns per-split partials."""
    batch, feat = x2d.shape
    itemsize = jnp.dtype(x2d.dtype).itemsize
    bt, tc, n_ct, n_bt, batch_tiled = _choose_tiling(batch, feat, itemsize, target_bytes)

    splits = 2 if n_ct >= _SPLIT_MIN_TILES else 1
    inner = pl.cdiv(n_ct, splits)
    has_overflow = splits * inner > n_ct
    col_partial = n_ct * tc != feat
    row_partial = n_bt * bt != batch

    def x_index(o, j, k):
        c = o * inner + j
        if has_overflow:
            c = jnp.minimum(c, n_ct - 1)   # keep the (skipped) overflow DMA in-bounds
        return (k, c)

    out_block = pl.BlockSpec((1, SUBLANES, LANES), lambda o, j, k: (o, 0, 0))
    out_struct = jax.ShapeDtypeStruct((splits, SUBLANES, LANES), jnp.float32)

    static = dict(batch=batch, feat=feat, batch_tile=bt, tile_cols=tc,
                  n_col_tiles=n_ct, n_bt=n_bt, inner=inner, batch_tiled=batch_tiled,
                  col_partial=col_partial, row_partial=row_partial,
                  has_overflow=has_overflow)

    if is_mask:
        kernel = functools.partial(_hmask_kernel, **static)
        out_shape = out_struct
        out_specs = out_block
        scratch = []
    else:
        kernel = functools.partial(_hloss_kernel, **static)
        out_shape = (out_struct, out_struct)
        out_specs = (out_block, out_block)
        # Column-sum scratch (resident across batch steps) only needs the real
        # tile width when the batch is actually tiled; tiny dummy otherwise.
        scr_cols = tc if batch_tiled else LANES
        scratch = [pltpu.VMEM((1, scr_cols), jnp.float32)]

    return pl.pallas_call(
        kernel,
        out_shape=out_shape,
        grid_spec=pltpu.PrefetchScalarGridSpec(
            num_scalar_prefetch=0,
            grid=(splits, inner, n_bt),
            in_specs=[pl.BlockSpec((bt, tc), x_index)],
            out_specs=out_specs,
            scratch_shapes=scratch,
        ),
        compiler_params=pltpu.CompilerParams(
            dimension_semantics=("parallel", "arbitrary", "arbitrary"),
            vmem_limit_bytes=_VMEM_LIMIT_BYTES,
        ),
    )(x2d)


def hloss(x, is_mask=False, *, block_bytes=None):
    """JAX/Pallas equivalent of HLoss.forward (result returned as float32)."""
    if x.ndim == 1:
        x = x[:, None]
    batch = x.shape[0]
    feat = int(math.prod(x.shape[1:]))
    total = batch * feat
    x2d = x.reshape(batch, feat)                      # metadata-only collapse
    target = block_bytes if block_bytes is not None else _default_block_bytes(
        jnp.dtype(x.dtype).itemsize)

    if is_mask:
        e_out = _hloss_partials(x2d, True, target)
        e_sum = jnp.sum(e_out[:, 0, 0])               # each split's broadcasted total
        return e_sum / jnp.float32(total)

    sq_out, cs2_out = _hloss_partials(x2d, False, target)
    s2 = jnp.sum(sq_out[:, 0, 0])                     # sum(x^2)
    c2 = jnp.sum(cs2_out[:, 0, 0])                    # sum_f (sum_b x[b,f])^2
    # mean(1 - x^2 + x.mean(0)^2) == 1 - sum(x^2)/N + sum_f colsum_f^2 / (B^2 * F)
    return 1.0 - s2 / jnp.float32(total) + c2 / jnp.float32(batch * batch * feat)


def _ref_hloss(x, is_mask):
    xf = x.astype(jnp.float32)
    if is_mask:
        return jnp.mean(((1.0 - xf) * xf) ** 2)
    return jnp.mean(1.0 - xf ** 2 + jnp.mean(xf, axis=0) ** 2)


if __name__ == "__main__":
    key = jax.random.PRNGKey(0)
    k1, k2, k3, k4 = jax.random.split(key, 4)

    # 1) Default small NCHW shape: F = 1024 (multiple of 128), single tile.
    x = jax.random.normal(k1, (2, 4, 16, 16), dtype=jnp.float32)
    for m in (False, True):
        out = jax.block_until_ready(jax.jit(lambda v, m=m: hloss(v, is_mask=m))(x))
        ref = _ref_hloss(x, m)
        assert jnp.allclose(out, ref, rtol=1e-5, atol=1e-5), (m, out, ref)

    # 2) F = 1600 (not a multiple of 128): exercises the in-kernel column mask on
    #    the single edge tile (no lax.slice copy, no JAX tail pass).
    y = jax.random.normal(k2, (2, 5, 20, 16), dtype=jnp.float32)
    for m in (False, True):
        out = jax.block_until_ready(jax.jit(lambda v, m=m: hloss(v, is_mask=m))(y))
        ref = _ref_hloss(y, m)
        assert jnp.allclose(out, ref, rtol=1e-5, atol=1e-5), (m, out, ref)

    # 3) Tiny forced block budget: exercises batch tiling with a partial last
    #    batch tile, the unsquared column-sum scratch, the 2-way core split with
    #    an odd tile count (overflow-tile skip), and the partial column tile.
    z = jax.random.normal(k3, (20, 1100), dtype=jnp.float32)
    for m in (False, True):
        out = jax.block_until_ready(
            jax.jit(lambda v, m=m: hloss(v, is_mask=m, block_bytes=4096))(z))
        ref = _ref_hloss(z, m)
        assert jnp.allclose(out, ref, rtol=1e-4, atol=1e-5), (m, out, ref)

    # 4) bf16 input (kernel upcasts to f32 in VMEM).
    w = jax.random.normal(k4, (4, 384), dtype=jnp.float32).astype(jnp.bfloat16)
    out = jax.block_until_ready(jax.jit(lambda v: hloss(v, is_mask=False))(w))
    ref = _ref_hloss(w, False)
    assert jnp.allclose(out, ref, rtol=1e-3, atol=1e-3), (out, ref)

    print("KERNEL_OK")
</pallas_src>

<mosaic_0001>
module attributes {stable_mosaic.version = 11 : i64} {
  func.func @_hloss_kernel(%arg0: i32, %arg1: i32, %arg2: i32, %arg3: memref<2x1024xf32, #tpu.memory_space<vmem>>, %arg4: memref<1x8x128xf32, #tpu.memory_space<vmem>>, %arg5: memref<1x8x128xf32, #tpu.memory_space<vmem>>, %arg6: memref<1x128xf32, #tpu.memory_space<vmem>>) attributes {dimension_semantics = [#tpu.dimension_semantics<parallel>, #tpu.dimension_semantics<arbitrary>, #tpu.dimension_semantics<arbitrary>], iteration_bounds = array<i64: 1, 1, 1>, scalar_prefetch = 0 : i64, scratch_operands = 1 : i64, tpu.core_type = #tpu.core_type<tc>, window_params = [{transform_indices = @transform_0, window_bounds = array<i64: 2, 1024>}, {transform_indices = @transform_1, window_bounds = array<i64: 1, 8, 128>}, {transform_indices = @transform_2, window_bounds = array<i64: 1, 8, 128>}]} {
    %c0_i32 = arith.constant 0 : i32
    %0 = arith.cmpi eq, %arg1, %c0_i32 : i32
    %c0_i32_0 = arith.constant 0 : i32
    %1 = arith.cmpi eq, %arg2, %c0_i32_0 : i32
    %2 = arith.andi %0, %1 : i1
    %3 = arith.extui %2 : i1 to i32
    %c0_i32_1 = arith.constant 0 : i32
    %4 = arith.cmpi ne, %3, %c0_i32_1 : i32
    scf.if %4 {
      %cst_18 = arith.constant 0.000000e+00 : f32
      %28 = vector.broadcast %cst_18 : f32 to vector<1x8x128xf32>
      %c0_19 = arith.constant 0 : index
      %c0_20 = arith.constant 0 : index
      %c0_21 = arith.constant 0 : index
      %29 = vector.load %arg4[%c0_19, %c0_20, %c0_21] : memref<1x8x128xf32, #tpu.memory_space<vmem>>, vector<1x8x128xf32>
      tpu.vector_store %arg4[%c0_19, %c0_20, %c0_21], %28 {strides = array<i32>} : memref<1x8x128xf32, #tpu.memory_space<vmem>>, vector<1x8x128xf32>,
      %cst_22 = arith.constant 0.000000e+00 : f32
      %30 = vector.broadcast %cst_22 : f32 to vector<1x8x128xf32>
      %c0_23 = arith.constant 0 : index
      %c0_24 = arith.constant 0 : index
      %c0_25 = arith.constant 0 : index
      %31 = vector.load %arg5[%c0_23, %c0_24, %c0_25] : memref<1x8x128xf32, #tpu.memory_space<vmem>>, vector<1x8x128xf32>
      tpu.vector_store %arg5[%c0_23, %c0_24, %c0_25], %30 {strides = array<i32>} : memref<1x8x128xf32, #tpu.memory_space<vmem>>, vector<1x8x128xf32>,
    } else {
    }
    %c0 = arith.constant 0 : index
    %c0_2 = arith.constant 0 : index
    %5 = vector.load %arg3[%c0, %c0_2] : memref<2x1024xf32, #tpu.memory_space<vmem>>, vector<2x1024xf32>
    %6 = arith.mulf %5, %5 : vector<2x1024xf32>
    %cst = arith.constant dense<0.000000e+00> : vector<1024xf32>
    %7 = vector.multi_reduction <add>, %6, %cst [0] : vector<2x1024xf32> to vector<1024xf32>
    %8 = vector.shape_cast %7 : vector<1024xf32> to vector<1x1024xf32>
    %cst_3 = arith.constant dense<0.000000e+00> : vector<1024xf32>
    %9 = vector.multi_reduction <add>, %5, %cst_3 [0] : vector<2x1024xf32> to vector<1024xf32>
    %10 = vector.shape_cast %9 : vector<1024xf32> to vector<1x1024xf32>
    %c0_4 = arith.constant 0 : index
    %c0_5 = arith.constant 0 : index
    %c0_6 = arith.constant 0 : index
    %11 = vector.load %arg4[%c0_4, %c0_5, %c0_6] : memref<1x8x128xf32, #tpu.memory_space<vmem>>, vector<1x8x128xf32>
    %12 = vector.shape_cast %8 : vector<1x1024xf32> to vector<1x1x1024xf32>
    %cst_7 = arith.constant dense<0.000000e+00> : vector<1xf32>
    %13 = vector.multi_reduction <add>, %12, %cst_7 [1, 2] : vector<1x1x1024xf32> to vector<1xf32>
    %14 = vector.shape_cast %13 : vector<1xf32> to vector<1x1x1xf32>
    %15 = vector.extract %14[0, 0, 0] : f32 from vector<1x1x1xf32>
    %16 = vector.broadcast %15 : f32 to vector<1x8x128xf32>
    %17 = arith.addf %11, %16 : vector<1x8x128xf32>
    %c0_8 = arith.constant 0 : index
    %c0_9 = arith.constant 0 : index
    %c0_10 = arith.constant 0 : index
    %18 = vector.load %arg4[%c0_8, %c0_9, %c0_10] : memref<1x8x128xf32, #tpu.memory_space<vmem>>, vector<1x8x128xf32>
    tpu.vector_store %arg4[%c0_8, %c0_9, %c0_10], %17 {strides = array<i32>} : memref<1x8x128xf32, #tpu.memory_space<vmem>>, vector<1x8x128xf32>,
    %c0_11 = arith.constant 0 : index
    %c0_12 = arith.constant 0 : index
    %c0_13 = arith.constant 0 : index
    %19 = vector.load %arg5[%c0_11, %c0_12, %c0_13] : memref<1x8x128xf32, #tpu.memory_space<vmem>>, vector<1x8x128xf32>
    %20 = arith.mulf %10, %10 : vector<1x1024xf32>
    %21 = vector.shape_cast %20 : vector<1x1024xf32> to vector<1x1x1024xf32>
    %cst_14 = arith.constant dense<0.000000e+00> : vector<1xf32>
    %22 = vector.multi_reduction <add>, %21, %cst_14 [1, 2] : vector<1x1x1024xf32> to vector<1xf32>
    %23 = vector.shape_cast %22 : vector<1xf32> to vector<1x1x1xf32>
    %24 = vector.extract %23[0, 0, 0] : f32 from vector<1x1x1xf32>
    %25 = vector.broadcast %24 : f32 to vector<1x8x128xf32>
    %26 = arith.addf %19, %25 : vector<1x8x128xf32>
    %c0_15 = arith.constant 0 : index
    %c0_16 = arith.constant 0 : index
    %c0_17 = arith.constant 0 : index
    %27 = vector.load %arg5[%c0_15, %c0_16, %c0_17] : memref<1x8x128xf32, #tpu.memory_space<vmem>>, vector<1x8x128xf32>
    tpu.vector_store %arg5[%c0_15, %c0_16, %c0_17], %26 {strides = array<i32>} : memref<1x8x128xf32, #tpu.memory_space<vmem>>, vector<1x8x128xf32>,
    return
  }
  func.func @transform_0(%arg0: i32, %arg1: i32, %arg2: i32) -> (i32, i32) {
    %c1_i32 = arith.constant 1 : i32
    %0 = arith.muli %arg0, %c1_i32 : i32
    %1 = arith.addi %0, %arg1 : i32
    %c0_i32 = arith.constant 0 : i32
    return %arg2, %1 : i32, i32
  }
  func.func @transform_1(%arg0: i32, %arg1: i32, %arg2: i32) -> (i32, i32, i32) {
    %c0_i32 = arith.constant 0 : i32
    %c0_i32_0 = arith.constant 0 : i32
    %c0_i32_1 = arith.constant 0 : i32
    return %arg0, %c0_i32, %c0_i32_0 : i32, i32, i32
  }
  func.func @transform_2(%arg0: i32, %arg1: i32, %arg2: i32) -> (i32, i32, i32) {
    %c0_i32 = arith.constant 0 : i32
    %c0_i32_0 = arith.constant 0 : i32
    %c0_i32_1 = arith.constant 0 : i32
    return %arg0, %c0_i32, %c0_i32_0 : i32, i32, i32
  }
}

</mosaic_0001>

<bundles_post_ra>
// kernel: _lambda_.1
= control target key start
LH: loop header
LB: loop body
LE: loop exit
PB: predicated region body
PF: predicated region fallthrough
CT: control target
= control target key end

     0   :  { %v50_v0 = vlaneseq  ;;  %v332_v3 = vmov 1983009808   ;;  %vm88_vm0 = vcmask 1041408   ;;  %vm246_vm1 = vcmask 1040384   ;;  %s412_s0 = inlined_call_operand.vmem [shape: f32[2,1024], index: 0, kind: input, shape index: {}]   ;;  %s413_s1 = inlined_call_operand.vmem [shape: f32[1,8,128], index: 1, kind: output, shape index: {0}]   ;;  %s414_s2 = inlined_call_operand.vmem [shape: f32[1,8,128], index: 2, kind: output, shape index: {1}]  }
   0x1   :  { %v40_v1 = vld [vmem:[%s412_s0] sm:$0xff]  ;;  %v41_v2 = vld [vmem:[%s412_s0 + $0x8] sm:$0xff]  ;;  %v48_v4 = vunpack.c.l.s4 %v332_v3 }
   0x2   :  { %v42_v5 = vmul.f32 %v40_v1, %v40_v1  ;;  %v43_v6 = vmul.f32 %v41_v2, %v41_v2  ;;  %v51_v7 = vshrl.u32 %v50_v0, 7  ;;  %v147_v11 = vcombine.high %v40_v1, %v40_v1 }
   0x3   :  { %v49_v8 = vunpack.c.0.s8 %v48_v4  ;;  %v164_v12 = vcombine.high %v41_v2, %v41_v2 }
   0x4   :  { %v46_v9 = vcombine.high %v42_v5, %v42_v5  ;;  %v63_v10 = vcombine.high %v43_v6, %v43_v6 }
   0x5   :  { %v52_v13 = vsub.s32 %v49_v8, %v51_v7 }
   0x7   :  { %v53_v14 = vrot.slane %v42_v5, %v52_v13  ;;  %v60_v15 = vrot.slane %v46_v9, %v52_v13  ;;  %v70_v16 = vrot.slane %v43_v6, %v52_v13  ;;  %v77_v17 = vrot.slane %v63_v10, %v52_v13 }
   0x8   :  { %v354_v18 = vrot.slane %v40_v1, %v52_v13  ;;  %v356_v19 = vrot.slane %v147_v11, %v52_v13  ;;  %v358_v20 = vrot.slane %v41_v2, %v52_v13  ;;  %v360_v21 = vrot.slane %v164_v12, %v52_v13 }
   0x9   :  { %v61_v22 = vcombine.high %v53_v14, %v53_v14  ;;  %v62_v23 = vcombine.high %v60_v15, %v60_v15  ;;  %v78_v24 = vcombine.high %v70_v16, %v70_v16  ;;  %v79_v25 = vcombine.high %v77_v17, %v77_v17 }
   0xa   :  { %v89_v26 = vsel %vm88_vm0, %v53_v14, 0.0  ;;  %v103_v27 = vsel %vm88_vm0, %v60_v15, 0.0  ;;  %v117_v28 = vsel %vm88_vm0, %v70_v16, 0.0  ;;  %v131_v29 = vsel %vm88_vm0, %v77_v17, 0.0 }
   0xb   :  { %v90_v30 = vrot.slane %v89_v26, 4  ;;  %v96_v31 = vsel %vm88_vm0, %v61_v22, 0.0  ;;  %v104_v32 = vrot.slane %v103_v27, 4  ;;  %v110_v33 = vsel %vm88_vm0, %v62_v23, 0.0 }
   0xc   :  { %v97_v34 = vrot.slane %v96_v31, 4  ;;  %v111_v35 = vrot.slane %v110_v33, 4  ;;  %v118_v36 = vrot.slane %v117_v28, 4  ;;  %v124_v37 = vsel %vm88_vm0, %v78_v24, 0.0 }
   0xd   :  { %v91_v38 = vadd.f32 %v90_v30, %v89_v26  ;;  %v105_v39 = vadd.f32 %v104_v32, %v103_v27  ;;  %v125_v40 = vrot.slane %v124_v37, 4  ;;  %v132_v41 = vrot.slane %v131_v29, 4 }
   0xe   :  { %v98_v42 = vadd.f32 %v97_v34, %v96_v31  ;;  %v112_v43 = vadd.f32 %v111_v35, %v110_v33  ;;  %v119_v44 = vadd.f32 %v118_v36, %v117_v28  ;;  %v138_v45 = vsel %vm88_vm0, %v79_v25, 0.0 }
   0xf   :  { %v92_v46 = vrot.slane %v91_v38, 2  ;;  %v106_v47 = vrot.slane %v105_v39, 2  ;;  %v126_v48 = vadd.f32 %v125_v40, %v124_v37  ;;  %v133_v49 = vadd.f32 %v132_v41, %v131_v29 }
  0x10   :  { %v99_v50 = vrot.slane %v98_v42, 2  ;;  %v113_v51 = vrot.slane %v112_v43, 2  ;;  %v120_v52 = vrot.slane %v119_v44, 2  ;;  %v139_v53 = vrot.slane %v138_v45, 4 }
  0x11   :  { %v93_v54 = vadd.f32 %v92_v46, %v91_v38  ;;  %v107_v55 = vadd.f32 %v106_v47, %v105_v39  ;;  %v127_v56 = vrot.slane %v126_v48, 2  ;;  %v134_v57 = vrot.slane %v133_v49, 2 }
  0x12   :  { %v100_v58 = vadd.f32 %v99_v50, %v98_v42  ;;  %v114_v59 = vadd.f32 %v113_v51, %v112_v43  ;;  %v121_v60 = vadd.f32 %v120_v52, %v119_v44  ;;  %v140_v61 = vadd.f32 %v139_v53, %v138_v45 }
  0x13   :  { %v94_v62 = vrot.slane %v93_v54, 1  ;;  %v108_v63 = vrot.slane %v107_v55, 1  ;;  %v128_v0 = vadd.f32 %v127_v56, %v126_v48  ;;  %v135_v1 = vadd.f32 %v134_v57, %v133_v49 }
  0x14   :  { %v101_v2 = vrot.slane %v100_v58, 1  ;;  %v115_v3 = vrot.slane %v114_v59, 1  ;;  %v122_v4 = vrot.slane %v121_v60, 1  ;;  %v141_v5 = vrot.slane %v140_v61, 2 }
  0x15   :  { %v95_v6 = vadd.f32 %v94_v62, %v93_v54  ;;  %v109_v7 = vadd.f32 %v108_v63, %v107_v55  ;;  %v129_v8 = vrot.slane %v128_v0, 1  ;;  %v136_v9 = vrot.slane %v135_v1, 1 }
  0x16   :  { %v102_v10 = vadd.f32 %v101_v2, %v100_v58  ;;  %v116_v11 = vadd.f32 %v115_v3, %v114_v59  ;;  %v123_v12 = vadd.f32 %v122_v4, %v121_v60  ;;  %v142_v13 = vadd.f32 %v141_v5, %v140_v61 }
  0x17   :  { %v130_v14 = vadd.f32 %v129_v8, %v128_v0  ;;  %v137_v15 = vadd.f32 %v136_v9, %v135_v1  ;;  %v247_v16 = vsel %vm246_vm1, %v95_v6, 0.0  ;;  %v250_v17 = vsel %vm246_vm1, %v109_v7, 0.0 }
  0x18   :  { %v143_v22 = vrot.slane %v142_v13, 1  ;;  %v248_v23 = vsel %vm246_vm1, %v102_v10, 0.0  ;;  %v252_v24 = vsel %vm246_vm1, %v116_v11, 0.0  ;;  %v254_v25 = vsel %vm246_vm1, %v123_v12, 0.0 }
  0x19   :  { %v249_v26 = vadd.f32 %v248_v23, %v247_v16  ;;  %v256_v27 = vsel %vm246_vm1, %v130_v14, 0.0  ;;  %v258_v28 = vsel %vm246_vm1, %v137_v15, 0.0  ;;  %v162_v29 = vcombine.high %v354_v18, %v354_v18 }
  0x1a   :  { %v144_v30 = vadd.f32 %v143_v22, %v142_v13  ;;  %v163_v31 = vcombine.high %v356_v19, %v356_v19  ;;  %v179_v32 = vcombine.high %v358_v20, %v358_v20  ;;  %v180_v33 = vcombine.high %v360_v21, %v360_v21 }
  0x1b   :  { %v251_v34 = vadd.f32 %v250_v17, %v249_v26  ;;  %v189_v35 = vsel %vm88_vm0, %v354_v18, 0.0  ;;  %v196_v36 = vsel %vm88_vm0, %v162_v29, 0.0  ;;  %v203_v37 = vsel %vm88_vm0, %v356_v19, 0.0 }
  0x1c   :  { %v260_v38 = vsel %vm246_vm1, %v144_v30, 0.0  ;;  %v190_v39 = vrot.slane %v189_v35, 4  ;;  %v197_v40 = vrot.slane %v196_v36, 4  ;;  %v204_v41 = vrot.slane %v203_v37, 4 }
  0x1d   :  { %v253_v42 = vadd.f32 %v252_v24, %v251_v34  ;;  %v210_v43 = vsel %vm88_vm0, %v163_v31, 0.0  ;;  %v217_v44 = vsel %vm88_vm0, %v358_v20, 0.0  ;;  %v224_v45 = vsel %vm88_vm0, %v179_v32, 0.0 }
  0x1e   :  { %v191_v46 = vadd.f32 %v190_v39, %v189_v35  ;;  %v198_v18 = vadd.f32 %v197_v40, %v196_v36  ;;  %v205_v47 = vadd.f32 %v204_v41, %v203_v37  ;;  %v211_v48 = vrot.slane %v210_v43, 4 }
  0x1f   :  { %v255_v49 = vadd.f32 %v254_v25, %v253_v42  ;;  %v218_v50 = vrot.slane %v217_v44, 4  ;;  %v225_v19 = vrot.slane %v224_v45, 4  ;;  %v231_v51 = vsel %vm88_vm0, %v360_v21, 0.0 }
  0x20   :  { %v192_v52 = vrot.slane %v191_v46, 2  ;;  %v199_v53 = vrot.slane %v198_v18, 2  ;;  %v206_v54 = vrot.slane %v205_v47, 2  ;;  %v212_v55 = vadd.f32 %v211_v48, %v210_v43 }
  0x21   :  { %v257_v56 = vadd.f32 %v256_v27, %v255_v49  ;;  %v219_v57 = vadd.f32 %v218_v50, %v217_v44  ;;  %v226_v58 = vadd.f32 %v225_v19, %v224_v45  ;;  %v232_v20 = vrot.slane %v231_v51, 4 }
  0x22   :  { %v193_v59 = vadd.f32 %v192_v52, %v191_v46  ;;  %v200_v60 = vadd.f32 %v199_v53, %v198_v18  ;;  %v207_v61 = vadd.f32 %v206_v54, %v205_v47  ;;  %v213_v62 = vrot.slane %v212_v55, 2 }
  0x23   :  { %v259_v63 = vadd.f32 %v258_v28, %v257_v56  ;;  %v220_v0 = vrot.slane %v219_v57, 2  ;;  %v227_v1 = vrot.slane %v226_v58, 2  ;;  %v233_v2 = vadd.f32 %v232_v20, %v231_v51 }
  0x24   :  { %v194_v3 = vrot.slane %v193_v59, 1  ;;  %v201_v4 = vrot.slane %v200_v60, 1  ;;  %v208_v5 = vrot.slane %v207_v61, 1  ;;  %v214_v21 = vadd.f32 %v213_v62, %v212_v55 }
  0x25   :  { %v261_v6 = vadd.f32 %v260_v38, %v259_v63  ;;  %v221_v7 = vadd.f32 %v220_v0, %v219_v57  ;;  %v228_v8 = vadd.f32 %v227_v1, %v226_v58  ;;  %v234_v9 = vrot.slane %v233_v2, 2 }
  0x26   :  { %v195_v10 = vadd.f32 %v194_v3, %v193_v59  ;;  %v202_v11 = vadd.f32 %v201_v4, %v200_v60  ;;  %v209_v12 = vadd.f32 %v208_v5, %v207_v61  ;;  %v215_v13 = vrot.slane %v214_v21, 1 }
  0x27   :  { %262 = vadd.xlane.f32.xlu0 %v261_v6  ;;  %v222_v14 = vrot.slane %v221_v7, 1  ;;  %v229_v15 = vrot.slane %v228_v8, 1  ;;  %v235_v16 = vadd.f32 %v234_v9, %v233_v2  ;;  %v238_v17 = vsel %vm88_vm0, %v180_v33, 0.0 }
  0x28   :  { %v216_v22 = vadd.f32 %v215_v13, %v214_v21  ;;  %v239_v23 = vrot.slane %v238_v17, 4  ;;  %v275_v24 = vmul.f32 %v195_v10, %v195_v10  ;;  %v276_v25 = vmul.f32 %v202_v11, %v202_v11 }
  0x29   :  { %v223_v26 = vadd.f32 %v222_v14, %v221_v7  ;;  %v230_v27 = vadd.f32 %v229_v15, %v228_v8  ;;  %v236_v28 = vrot.slane %v235_v16, 1  ;;  %v277_v29 = vmul.f32 %v209_v12, %v209_v12 }
  0x2a   :  { %v240_v30 = vadd.f32 %v239_v23, %v238_v17  ;;  %v278_v31 = vmul.f32 %v216_v22, %v216_v22  ;;  %v283_v32 = vsel %vm246_vm1, %v275_v24, 0.0  ;;  %v284_v34 = vsel %vm246_vm1, %v276_v25, 0.0 }
  0x2b   :  { %v237_v35 = vadd.f32 %v236_v28, %v235_v16  ;;  %v279_v36 = vmul.f32 %v223_v26, %v223_v26  ;;  %v285_v37 = vadd.f32 %v284_v34, %v283_v32  ;;  %v280_v39 = vmul.f32 %v230_v27, %v230_v27 }
  0x2c   :  { %v241_v38 = vrot.slane %v240_v30, 2  ;;  %v286_v33 = vsel %vm246_vm1, %v277_v29, 0.0  ;;  %v288_v40 = vsel %vm246_vm1, %v278_v31, 0.0 }
  0x2d   :  { %v287_v41 = vadd.f32 %v286_v33, %v285_v37  ;;  %v281_v43 = vmul.f32 %v237_v35, %v237_v35  ;;  %v290_v44 = vsel %vm246_vm1, %v279_v36, 0.0  ;;  %v292_v18 = vsel %vm246_vm1, %v280_v39, 0.0 }
  0x2e   :  { %v242_v42 = vadd.f32 %v241_v38, %v240_v30 }
  0x2f   :  { %v289_v45 = vadd.f32 %v288_v40, %v287_v41  ;;  %v294_v49 = vsel %vm246_vm1, %v281_v43, 0.0 }
  0x30   :  { %v243_v46 = vrot.slane %v242_v42, 1 }
  0x31   :  { %v291_v47 = vadd.f32 %v290_v44, %v289_v45 }
  0x32   :  { %v244_v48 = vadd.f32 %v243_v46, %v242_v42 }
  0x33   :  { %v293_v50 = vadd.f32 %v292_v18, %v291_v47 }
  0x34   :  { %v282_v19 = vmul.f32 %v244_v48, %v244_v48 }
  0x35   :  { %v295_v51 = vadd.f32 %v294_v49, %v293_v50 }
  0x36   :  { %v296_v52 = vsel %vm246_vm1, %v282_v19, 0.0 }
  0x37   :  { %v297_v53 = vadd.f32 %v296_v52, %v295_v51 }
  0x39   :  { %298 = vadd.xlane.f32.xlu0 %v297_v53 }
  0xb0   :  { %v263_v54 = vpop.xlane.xlu0 %262 }
  0xb1   :  { %v264_v55 = vrot.slane %v263_v54, 4 }
  0xb3   :  { %v265_v56 = vadd.f32 %v264_v55, %v263_v54 }
  0xb5   :  { %v266_v57 = vrot.slane %v265_v56, 2 }
  0xb7   :  { %v267_v58 = vadd.f32 %v266_v57, %v265_v56 }
  0xb9   :  { %v268_v20 = vrot.slane %v267_v58, 1 }
  0xbb   :  { %v269_v59 = vadd.f32 %v268_v20, %v267_v58 }
  0xbd   :  { %324 = vpush %v269_v59 }
  0xc2   :  { %v299_v60 = vpop.xlane.xlu0 %298 }
  0xc3   :  { %v300_v61 = vrot.slane %v299_v60, 4 }
  0xc5   :  { %v301_v62 = vadd.f32 %v300_v61, %v299_v60 }
  0xc7   :  { %v302_v63 = vrot.slane %v301_v62, 2 }
  0xc9   :  { %v303_v0 = vadd.f32 %v302_v63, %v301_v62 }
  0xcb   :  { %v304_v1 = vrot.slane %v303_v0, 1 }
  0xcd   :  { %v305_v2 = vadd.f32 %v304_v1, %v303_v0 }
  0xcf   :  { %326 = vpush %v305_v2 }
  0xee   :  { %s325_s0 = spop %324 }
  0xef   :  { %v271_v3 = vstv %s325_s0 }
  0xf0   :  { %273 = vst [vmem:[%s413_s1] sm:$0xff] %v271_v3 }
 0x100   :  { %s327_s15 = spop %326 }
 0x101   :  { %v307_v4 = vstv %s327_s15 }
 0x102   :  { %309 = vst [vmem:[%s414_s2] sm:$0xff] %v307_v4 }

</bundles_post_ra>
